<compile_context>
chip_gen: v5e
topology: v5e:2x2
jax: 0.10.0
libtpu: 0.0.40
codegen_flags: <defaults>
</compile_context>

<pallas_src>
import jax
import jax.numpy as jnp
from jax import lax
from jax.experimental import pallas as pl
from jax.experimental.pallas import tpu as pltpu


def lstm_linear_kernel(x_ref, wih_ref, whh_ref, b_ref, wlin_ref, blin_ref,
                       out_ref, pre_ref, hs_ref):
    """Fused LSTM + Linear forward.

    x_ref:    (S*B, D)   time-major flattened input (row = t*B + b)
    wih_ref:  (D, 4H)    W_ih^T, gate blocks ordered (i, f, o, g)
    whh_ref:  (H, 4H)    W_hh^T, gate blocks ordered (i, f, o, g)
    b_ref:    (1, 4H)    b_ih + b_hh, gate blocks ordered (i, f, o, g)
    wlin_ref: (H, C)     W_linear^T
    blin_ref: (1, C)     b_linear
    out_ref:  (B*S, C)   batch-major flattened output (row = b*S + t)
    pre_ref:  (S*B, 4H)  VMEM scratch: hoisted input projection, time-major
    hs_ref:   (B, S, H)  VMEM scratch: per-step hidden states, batch-major
    """
    B, S, H = hs_ref.shape

    wih = wih_ref[...]
    whh = whh_ref[...]
    bias = b_ref[...]
    wlin = wlin_ref[...]
    blin = blin_ref[...]

    # --- Hoisted input projection for ALL timesteps: ONE (S*B,D)@(D,4H) matmul
    #     (off the recurrence critical path), bias folded in, time-major rows.
    pre_ref[...] = (
        jnp.dot(x_ref[...], wih, preferred_element_type=jnp.float32) + bias
    )

    # --- Serial recurrence: only h @ W_hh + gate nonlinearities remain per step.
    #     S is a compile-time constant, so this fully unrolls for the LLO
    #     scheduler.  (For large S, switch to lax.fori_loop to bound code size.)
    h = jnp.zeros((B, H), jnp.float32)
    c = jnp.zeros((B, H), jnp.float32)
    for t in range(S):
        # Contiguous time-major (B, 4H) slab for this step.
        gates = pre_ref[pl.ds(t * B, B), :] + jnp.dot(
            h, whh, preferred_element_type=jnp.float32
        )  # (B, 4H)
        # Gate order (i, f, o, g): one sigmoid covers i/f/o, one tanh covers g.
        sig = jax.nn.sigmoid(gates[:, : 3 * H])
        g = jnp.tanh(gates[:, 3 * H:])
        i_g = sig[:, :H]
        f_g = sig[:, H: 2 * H]
        o_g = sig[:, 2 * H: 3 * H]
        c = f_g * c + i_g * g
        h = o_g * jnp.tanh(c)
        # Not on the serial dependency chain: only read back after the loop.
        hs_ref[:, t, :] = h

    # Dropout(p=0) is identity at inference.
    # TODO(synk): training-mode dropout (p > 0) would build a mask here with
    #             pltpu.prng_seed / pltpu.prng_random_bits.

    # --- Hoisted output Linear: ONE (B*S,H)@(H,C) matmul and ONE store.
    hs_flat = hs_ref[...].reshape(B * S, H)  # tile-preserving reshape
    out_ref[...] = (
        jnp.dot(hs_flat, wlin, preferred_element_type=jnp.float32) + blin
    ).astype(out_ref.dtype)


def _regroup_gates(w):
    """Permute gate blocks along the last axis: PyTorch (i, f, g, o) -> (i, f, o, g)."""
    i, f, g, o = jnp.split(w, 4, axis=-1)
    return jnp.concatenate([i, f, o, g], axis=-1)


@jax.jit
def skeleton_action_forward(x, params):
    """x: (batch, seq_len, input_size) float32 -> (batch, seq_len, num_class)."""
    w_ih, w_hh, b_ih, b_hh, w_lin, b_lin = params
    B, S, D = x.shape
    H = w_hh.shape[1]
    C = w_lin.shape[0]

    # One-time weight prep (fused by XLA under jit): transpose for (M,K)@(K,N)
    # MXU matmuls and permute gate blocks so the sigmoid gates are contiguous.
    wih_t = _regroup_gates(jnp.transpose(w_ih))               # (D, 4H)
    whh_t = _regroup_gates(jnp.transpose(w_hh))               # (H, 4H)
    bias = _regroup_gates((b_ih + b_hh).reshape(1, 4 * H))    # (1, 4H)
    wlin_t = jnp.transpose(w_lin)                             # (H, C)
    blin = b_lin.reshape(1, C)                                # (1, C)

    # Time-major flatten of x (row = t*B + b) so the in-kernel per-step read of
    # the hoisted projection is a contiguous slab.  256 bytes; fused by XLA.
    x_tm = jnp.transpose(x, (1, 0, 2)).reshape(S * B, D)

    out_flat = pl.pallas_call(
        lstm_linear_kernel,
        out_shape=jax.ShapeDtypeStruct((B * S, C), jnp.float32),
        in_specs=[pl.BlockSpec(memory_space=pltpu.MemorySpace.VMEM)] * 6,
        out_specs=pl.BlockSpec(memory_space=pltpu.MemorySpace.VMEM),
        scratch_shapes=[
            pltpu.VMEM((S * B, 4 * H), jnp.float32),  # time-major input projection
            pltpu.VMEM((B, S, H), jnp.float32),       # per-step hidden states
        ],
        # NOTE (review #3): on v7x (2 TensorCores) a grid=(B,) with
        # dimension_semantics=("parallel",) would put the two independent batch
        # recurrences on separate cores; on v5e/v6e (1 TC) it would only add
        # serial grid-step overhead, so it is left off here.
    )(x_tm, wih_t, whh_t, bias, wlin_t, blin)

    return out_flat.reshape(B, S, C)


def skeleton_action_reference(x, params):
    """Pure-JAX reference matching torch.nn.LSTM(batch_first=True) + Linear."""
    w_ih, w_hh, b_ih, b_hh, w_lin, b_lin = params
    B, S, D = x.shape
    H = w_hh.shape[1]

    def step(carry, x_t):
        h, c = carry
        gates = x_t @ w_ih.T + b_ih + h @ w_hh.T + b_hh
        i = jax.nn.sigmoid(gates[:, 0 * H:1 * H])
        f = jax.nn.sigmoid(gates[:, 1 * H:2 * H])
        g = jnp.tanh(gates[:, 2 * H:3 * H])
        o = jax.nn.sigmoid(gates[:, 3 * H:4 * H])
        c_new = f * c + i * g
        h_new = o * jnp.tanh(c_new)
        return (h_new, c_new), h_new

    h0 = jnp.zeros((B, H), jnp.float32)
    c0 = jnp.zeros((B, H), jnp.float32)
    _, hs = lax.scan(step, (h0, c0), jnp.transpose(x, (1, 0, 2)))  # (S, B, H)
    hs = jnp.transpose(hs, (1, 0, 2))                              # (B, S, H)
    return hs @ w_lin.T + b_lin


if __name__ == "__main__":
    # Small shapes consistent with the module: batch=2, seq=8, input=4, hidden=32, classes=8.
    B, S, D, H, C = 2, 8, 4, 32, 8

    key = jax.random.PRNGKey(0)
    ks = jax.random.split(key, 7)
    bound = 1.0 / (H ** 0.5)
    w_ih = jax.random.uniform(ks[0], (4 * H, D), jnp.float32, -bound, bound)
    w_hh = jax.random.uniform(ks[1], (4 * H, H), jnp.float32, -bound, bound)
    b_ih = jax.random.uniform(ks[2], (4 * H,), jnp.float32, -bound, bound)
    b_hh = jax.random.uniform(ks[3], (4 * H,), jnp.float32, -bound, bound)
    w_lin = jax.random.uniform(ks[4], (C, H), jnp.float32, -0.1, 0.1)
    b_lin = jnp.zeros((C,), jnp.float32)
    params = (w_ih, w_hh, b_ih, b_hh, w_lin, b_lin)

    x = jax.random.normal(ks[5], (B, S, D), jnp.float32)

    out = jax.block_until_ready(skeleton_action_forward(x, params))
    ref = skeleton_action_reference(x, params)

    assert out.shape == (B, S, C), out.shape
    assert jnp.allclose(out, ref, atol=1e-5, rtol=1e-5), float(jnp.max(jnp.abs(out - ref)))
    print("KERNEL_OK")
</pallas_src>

<mosaic_0001>
module attributes {stable_mosaic.version = 11 : i64} {
  func.func @lstm_linear_kernel(%arg0: memref<16x4xf32, #tpu.memory_space<vmem>>, %arg1: memref<4x128xf32, #tpu.memory_space<vmem>>, %arg2: memref<32x128xf32, #tpu.memory_space<vmem>>, %arg3: memref<1x128xf32, #tpu.memory_space<vmem>>, %arg4: memref<32x8xf32, #tpu.memory_space<vmem>>, %arg5: memref<1x8xf32, #tpu.memory_space<vmem>>, %arg6: memref<16x8xf32, #tpu.memory_space<vmem>>, %arg7: memref<16x128xf32, #tpu.memory_space<vmem>>, %arg8: memref<2x8x32xf32, #tpu.memory_space<vmem>>) attributes {dimension_semantics = [], scalar_prefetch = 0 : i64, scratch_operands = 2 : i64, tpu.core_type = #tpu.core_type<tc>} {
    %c0 = arith.constant 0 : index
    %c0_0 = arith.constant 0 : index
    %0 = vector.load %arg1[%c0, %c0_0] : memref<4x128xf32, #tpu.memory_space<vmem>>, vector<4x128xf32>
    %c0_1 = arith.constant 0 : index
    %c0_2 = arith.constant 0 : index
    %1 = vector.load %arg2[%c0_1, %c0_2] : memref<32x128xf32, #tpu.memory_space<vmem>>, vector<32x128xf32>
    %c0_3 = arith.constant 0 : index
    %c0_4 = arith.constant 0 : index
    %2 = vector.load %arg3[%c0_3, %c0_4] : memref<1x128xf32, #tpu.memory_space<vmem>>, vector<1x128xf32>
    %c0_5 = arith.constant 0 : index
    %c0_6 = arith.constant 0 : index
    %3 = vector.load %arg4[%c0_5, %c0_6] : memref<32x8xf32, #tpu.memory_space<vmem>>, vector<32x8xf32>
    %c0_7 = arith.constant 0 : index
    %c0_8 = arith.constant 0 : index
    %4 = vector.load %arg5[%c0_7, %c0_8] : memref<1x8xf32, #tpu.memory_space<vmem>>, vector<1x8xf32>
    %c0_9 = arith.constant 0 : index
    %c0_10 = arith.constant 0 : index
    %5 = vector.load %arg0[%c0_9, %c0_10] : memref<16x4xf32, #tpu.memory_space<vmem>>, vector<16x4xf32>
    %cst = arith.constant dense<0.000000e+00> : vector<16x128xf32>
    %6 = tpu.matmul %5, %0, %cst {dimension_numbers = #tpu.dot_dimension_numbers<[1], [0], [0], [1], [0, 0, 1, 1], [], []>} : vector<16x4xf32>, vector<4x128xf32>, vector<16x128xf32> -> vector<16x128xf32>
    %7 = vector.broadcast %2 : vector<1x128xf32> to vector<16x128xf32>
    %8 = arith.addf %6, %7 : vector<16x128xf32>
    %c0_11 = arith.constant 0 : index
    %c0_12 = arith.constant 0 : index
    %9 = vector.load %arg7[%c0_11, %c0_12] : memref<16x128xf32, #tpu.memory_space<vmem>>, vector<16x128xf32>
    tpu.vector_store %arg7[%c0_11, %c0_12], %8 {strides = array<i32>} : memref<16x128xf32, #tpu.memory_space<vmem>>, vector<16x128xf32>,
    %cst_13 = arith.constant 0.000000e+00 : f32
    %10 = vector.broadcast %cst_13 : f32 to vector<2x32xf32>
    %cst_14 = arith.constant 0.000000e+00 : f32
    %11 = vector.broadcast %cst_14 : f32 to vector<2x32xf32>
    %c0_15 = arith.constant 0 : index
    %c0_16 = arith.constant 0 : index
    %12 = vector.load %arg7[%c0_15, %c0_16] : memref<16x128xf32, #tpu.memory_space<vmem>>, vector<2x128xf32>
    %cst_17 = arith.constant dense<0.000000e+00> : vector<2x128xf32>
    %13 = tpu.matmul %10, %1, %cst_17 {dimension_numbers = #tpu.dot_dimension_numbers<[1], [0], [0], [1], [0, 0, 1, 1], [], []>} : vector<2x32xf32>, vector<32x128xf32>, vector<2x128xf32> -> vector<2x128xf32>
    %14 = arith.addf %12, %13 : vector<2x128xf32>
    %15 = vector.extract_strided_slice %14 {offsets = [0, 0], sizes = [2, 96], strides = [1, 1]} : vector<2x128xf32> to vector<2x96xf32>
    %16 = arith.negf %15 : vector<2x96xf32>
    %17 = math.exp %16 : vector<2x96xf32>
    %cst_18 = arith.constant 1.000000e+00 : f32
    %18 = vector.broadcast %cst_18 : f32 to vector<2x96xf32>
    %19 = arith.addf %18, %17 : vector<2x96xf32>
    %20 = arith.divf %18, %19 : vector<2x96xf32>
    %21 = vector.extract_strided_slice %14 {offsets = [0, 96], sizes = [2, 32], strides = [1, 1]} : vector<2x128xf32> to vector<2x32xf32>
    %22 = math.tanh %21 : vector<2x32xf32>
    %23 = vector.extract_strided_slice %20 {offsets = [0, 0], sizes = [2, 32], strides = [1, 1]} : vector<2x96xf32> to vector<2x32xf32>
    %24 = vector.extract_strided_slice %20 {offsets = [0, 32], sizes = [2, 32], strides = [1, 1]} : vector<2x96xf32> to vector<2x32xf32>
    %25 = vector.extract_strided_slice %20 {offsets = [0, 64], sizes = [2, 32], strides = [1, 1]} : vector<2x96xf32> to vector<2x32xf32>
    %26 = arith.mulf %24, %11 : vector<2x32xf32>
    %27 = arith.mulf %23, %22 : vector<2x32xf32>
    %28 = arith.addf %26, %27 : vector<2x32xf32>
    %29 = math.tanh %28 : vector<2x32xf32>
    %30 = arith.mulf %25, %29 : vector<2x32xf32>
    %c0_19 = arith.constant 0 : index
    %c0_20 = arith.constant 0 : index
    %c0_21 = arith.constant 0 : index
    %31 = vector.load %arg8[%c0_19, %c0_20, %c0_21] : memref<2x8x32xf32, #tpu.memory_space<vmem>>, vector<2x1x32xf32>
    %32 = vector.shape_cast %31 : vector<2x1x32xf32> to vector<2x32xf32>
    %33 = vector.shape_cast %30 : vector<2x32xf32> to vector<2x1x32xf32>
    tpu.vector_store %arg8[%c0_19, %c0_20, %c0_21], %33 {strides = array<i32>} : memref<2x8x32xf32, #tpu.memory_space<vmem>>, vector<2x1x32xf32>,
    %c2 = arith.constant 2 : index
    %c0_22 = arith.constant 0 : index
    %34 = vector.load %arg7[%c2, %c0_22] : memref<16x128xf32, #tpu.memory_space<vmem>>, vector<2x128xf32>
    %cst_23 = arith.constant dense<0.000000e+00> : vector<2x128xf32>
    %35 = tpu.matmul %30, %1, %cst_23 {dimension_numbers = #tpu.dot_dimension_numbers<[1], [0], [0], [1], [0, 0, 1, 1], [], []>} : vector<2x32xf32>, vector<32x128xf32>, vector<2x128xf32> -> vector<2x128xf32>
    %36 = arith.addf %34, %35 : vector<2x128xf32>
    %37 = vector.extract_strided_slice %36 {offsets = [0, 0], sizes = [2, 96], strides = [1, 1]} : vector<2x128xf32> to vector<2x96xf32>
    %38 = arith.negf %37 : vector<2x96xf32>
    %39 = math.exp %38 : vector<2x96xf32>
    %cst_24 = arith.constant 1.000000e+00 : f32
    %40 = vector.broadcast %cst_24 : f32 to vector<2x96xf32>
    %41 = arith.addf %40, %39 : vector<2x96xf32>
    %42 = arith.divf %40, %41 : vector<2x96xf32>
    %43 = vector.extract_strided_slice %36 {offsets = [0, 96], sizes = [2, 32], strides = [1, 1]} : vector<2x128xf32> to vector<2x32xf32>
    %44 = math.tanh %43 : vector<2x32xf32>
    %45 = vector.extract_strided_slice %42 {offsets = [0, 0], sizes = [2, 32], strides = [1, 1]} : vector<2x96xf32> to vector<2x32xf32>
    %46 = vector.extract_strided_slice %42 {offsets = [0, 32], sizes = [2, 32], strides = [1, 1]} : vector<2x96xf32> to vector<2x32xf32>
    %47 = vector.extract_strided_slice %42 {offsets = [0, 64], sizes = [2, 32], strides = [1, 1]} : vector<2x96xf32> to vector<2x32xf32>
    %48 = arith.mulf %46, %28 : vector<2x32xf32>
    %49 = arith.mulf %45, %44 : vector<2x32xf32>
    %50 = arith.addf %48, %49 : vector<2x32xf32>
    %51 = math.tanh %50 : vector<2x32xf32>
    %52 = arith.mulf %47, %51 : vector<2x32xf32>
    %c0_25 = arith.constant 0 : index
    %c1 = arith.constant 1 : index
    %c0_26 = arith.constant 0 : index
    %53 = vector.load %arg8[%c0_25, %c1, %c0_26] : memref<2x8x32xf32, #tpu.memory_space<vmem>>, vector<2x1x32xf32>
    %54 = vector.shape_cast %53 : vector<2x1x32xf32> to vector<2x32xf32>
    %55 = vector.shape_cast %52 : vector<2x32xf32> to vector<2x1x32xf32>
    tpu.vector_store %arg8[%c0_25, %c1, %c0_26], %55 {strides = array<i32>} : memref<2x8x32xf32, #tpu.memory_space<vmem>>, vector<2x1x32xf32>,
    %c4 = arith.constant 4 : index
    %c0_27 = arith.constant 0 : index
    %56 = vector.load %arg7[%c4, %c0_27] : memref<16x128xf32, #tpu.memory_space<vmem>>, vector<2x128xf32>
    %cst_28 = arith.constant dense<0.000000e+00> : vector<2x128xf32>
    %57 = tpu.matmul %52, %1, %cst_28 {dimension_numbers = #tpu.dot_dimension_numbers<[1], [0], [0], [1], [0, 0, 1, 1], [], []>} : vector<2x32xf32>, vector<32x128xf32>, vector<2x128xf32> -> vector<2x128xf32>
    %58 = arith.addf %56, %57 : vector<2x128xf32>
    %59 = vector.extract_strided_slice %58 {offsets = [0, 0], sizes = [2, 96], strides = [1, 1]} : vector<2x128xf32> to vector<2x96xf32>
    %60 = arith.negf %59 : vector<2x96xf32>
    %61 = math.exp %60 : vector<2x96xf32>
    %cst_29 = arith.constant 1.000000e+00 : f32
    %62 = vector.broadcast %cst_29 : f32 to vector<2x96xf32>
    %63 = arith.addf %62, %61 : vector<2x96xf32>
    %64 = arith.divf %62, %63 : vector<2x96xf32>
    %65 = vector.extract_strided_slice %58 {offsets = [0, 96], sizes = [2, 32], strides = [1, 1]} : vector<2x128xf32> to vector<2x32xf32>
    %66 = math.tanh %65 : vector<2x32xf32>
    %67 = vector.extract_strided_slice %64 {offsets = [0, 0], sizes = [2, 32], strides = [1, 1]} : vector<2x96xf32> to vector<2x32xf32>
    %68 = vector.extract_strided_slice %64 {offsets = [0, 32], sizes = [2, 32], strides = [1, 1]} : vector<2x96xf32> to vector<2x32xf32>
    %69 = vector.extract_strided_slice %64 {offsets = [0, 64], sizes = [2, 32], strides = [1, 1]} : vector<2x96xf32> to vector<2x32xf32>
    %70 = arith.mulf %68, %50 : vector<2x32xf32>
    %71 = arith.mulf %67, %66 : vector<2x32xf32>
    %72 = arith.addf %70, %71 : vector<2x32xf32>
    %73 = math.tanh %72 : vector<2x32xf32>
    %74 = arith.mulf %69, %73 : vector<2x32xf32>
    %c0_30 = arith.constant 0 : index
    %c2_31 = arith.constant 2 : index
    %c0_32 = arith.constant 0 : index
    %75 = vector.load %arg8[%c0_30, %c2_31, %c0_32] : memref<2x8x32xf32, #tpu.memory_space<vmem>>, vector<2x1x32xf32>
    %76 = vector.shape_cast %75 : vector<2x1x32xf32> to vector<2x32xf32>
    %77 = vector.shape_cast %74 : vector<2x32xf32> to vector<2x1x32xf32>
    tpu.vector_store %arg8[%c0_30, %c2_31, %c0_32], %77 {strides = array<i32>} : memref<2x8x32xf32, #tpu.memory_space<vmem>>, vector<2x1x32xf32>,
    %c6 = arith.constant 6 : index
    %c0_33 = arith.constant 0 : index
    %78 = vector.load %arg7[%c6, %c0_33] : memref<16x128xf32, #tpu.memory_space<vmem>>, vector<2x128xf32>
    %cst_34 = arith.constant dense<0.000000e+00> : vector<2x128xf32>
    %79 = tpu.matmul %74, %1, %cst_34 {dimension_numbers = #tpu.dot_dimension_numbers<[1], [0], [0], [1], [0, 0, 1, 1], [], []>} : vector<2x32xf32>, vector<32x128xf32>, vector<2x128xf32> -> vector<2x128xf32>
    %80 = arith.addf %78, %79 : vector<2x128xf32>
    %81 = vector.extract_strided_slice %80 {offsets = [0, 0], sizes = [2, 96], strides = [1, 1]} : vector<2x128xf32> to vector<2x96xf32>
    %82 = arith.negf %81 : vector<2x96xf32>
    %83 = math.exp %82 : vector<2x96xf32>
    %cst_35 = arith.constant 1.000000e+00 : f32
    %84 = vector.broadcast %cst_35 : f32 to vector<2x96xf32>
    %85 = arith.addf %84, %83 : vector<2x96xf32>
    %86 = arith.divf %84, %85 : vector<2x96xf32>
    %87 = vector.extract_strided_slice %80 {offsets = [0, 96], sizes = [2, 32], strides = [1, 1]} : vector<2x128xf32> to vector<2x32xf32>
    %88 = math.tanh %87 : vector<2x32xf32>
    %89 = vector.extract_strided_slice %86 {offsets = [0, 0], sizes = [2, 32], strides = [1, 1]} : vector<2x96xf32> to vector<2x32xf32>
    %90 = vector.extract_strided_slice %86 {offsets = [0, 32], sizes = [2, 32], strides = [1, 1]} : vector<2x96xf32> to vector<2x32xf32>
    %91 = vector.extract_strided_slice %86 {offsets = [0, 64], sizes = [2, 32], strides = [1, 1]} : vector<2x96xf32> to vector<2x32xf32>
    %92 = arith.mulf %90, %72 : vector<2x32xf32>
    %93 = arith.mulf %89, %88 : vector<2x32xf32>
    %94 = arith.addf %92, %93 : vector<2x32xf32>
    %95 = math.tanh %94 : vector<2x32xf32>
    %96 = arith.mulf %91, %95 : vector<2x32xf32>
    %c0_36 = arith.constant 0 : index
    %c3 = arith.constant 3 : index
    %c0_37 = arith.constant 0 : index
    %97 = vector.load %arg8[%c0_36, %c3, %c0_37] : memref<2x8x32xf32, #tpu.memory_space<vmem>>, vector<2x1x32xf32>
    %98 = vector.shape_cast %97 : vector<2x1x32xf32> to vector<2x32xf32>
    %99 = vector.shape_cast %96 : vector<2x32xf32> to vector<2x1x32xf32>
    tpu.vector_store %arg8[%c0_36, %c3, %c0_37], %99 {strides = array<i32>} : memref<2x8x32xf32, #tpu.memory_space<vmem>>, vector<2x1x32xf32>,
    %c8 = arith.constant 8 : index
    %c0_38 = arith.constant 0 : index
    %100 = vector.load %arg7[%c8, %c0_38] : memref<16x128xf32, #tpu.memory_space<vmem>>, vector<2x128xf32>
    %cst_39 = arith.constant dense<0.000000e+00> : vector<2x128xf32>
    %101 = tpu.matmul %96, %1, %cst_39 {dimension_numbers = #tpu.dot_dimension_numbers<[1], [0], [0], [1], [0, 0, 1, 1], [], []>} : vector<2x32xf32>, vector<32x128xf32>, vector<2x128xf32> -> vector<2x128xf32>
    %102 = arith.addf %100, %101 : vector<2x128xf32>
    %103 = vector.extract_strided_slice %102 {offsets = [0, 0], sizes = [2, 96], strides = [1, 1]} : vector<2x128xf32> to vector<2x96xf32>
    %104 = arith.negf %103 : vector<2x96xf32>
    %105 = math.exp %104 : vector<2x96xf32>
    %cst_40 = arith.constant 1.000000e+00 : f32
    %106 = vector.broadcast %cst_40 : f32 to vector<2x96xf32>
    %107 = arith.addf %106, %105 : vector<2x96xf32>
    %108 = arith.divf %106, %107 : vector<2x96xf32>
    %109 = vector.extract_strided_slice %102 {offsets = [0, 96], sizes = [2, 32], strides = [1, 1]} : vector<2x128xf32> to vector<2x32xf32>
    %110 = math.tanh %109 : vector<2x32xf32>
    %111 = vector.extract_strided_slice %108 {offsets = [0, 0], sizes = [2, 32], strides = [1, 1]} : vector<2x96xf32> to vector<2x32xf32>
    %112 = vector.extract_strided_slice %108 {offsets = [0, 32], sizes = [2, 32], strides = [1, 1]} : vector<2x96xf32> to vector<2x32xf32>
    %113 = vector.extract_strided_slice %108 {offsets = [0, 64], sizes = [2, 32], strides = [1, 1]} : vector<2x96xf32> to vector<2x32xf32>
    %114 = arith.mulf %112, %94 : vector<2x32xf32>
    %115 = arith.mulf %111, %110 : vector<2x32xf32>
    %116 = arith.addf %114, %115 : vector<2x32xf32>
    %117 = math.tanh %116 : vector<2x32xf32>
    %118 = arith.mulf %113, %117 : vector<2x32xf32>
    %c0_41 = arith.constant 0 : index
    %c4_42 = arith.constant 4 : index
    %c0_43 = arith.constant 0 : index
    %119 = vector.load %arg8[%c0_41, %c4_42, %c0_43] : memref<2x8x32xf32, #tpu.memory_space<vmem>>, vector<2x1x32xf32>
    %120 = vector.shape_cast %119 : vector<2x1x32xf32> to vector<2x32xf32>
    %121 = vector.shape_cast %118 : vector<2x32xf32> to vector<2x1x32xf32>
    tpu.vector_store %arg8[%c0_41, %c4_42, %c0_43], %121 {strides = array<i32>} : memref<2x8x32xf32, #tpu.memory_space<vmem>>, vector<2x1x32xf32>,
    %c10 = arith.constant 10 : index
    %c0_44 = arith.constant 0 : index
    %122 = vector.load %arg7[%c10, %c0_44] : memref<16x128xf32, #tpu.memory_space<vmem>>, vector<2x128xf32>
    %cst_45 = arith.constant dense<0.000000e+00> : vector<2x128xf32>
    %123 = tpu.matmul %118, %1, %cst_45 {dimension_numbers = #tpu.dot_dimension_numbers<[1], [0], [0], [1], [0, 0, 1, 1], [], []>} : vector<2x32xf32>, vector<32x128xf32>, vector<2x128xf32> -> vector<2x128xf32>
    %124 = arith.addf %122, %123 : vector<2x128xf32>
    %125 = vector.extract_strided_slice %124 {offsets = [0, 0], sizes = [2, 96], strides = [1, 1]} : vector<2x128xf32> to vector<2x96xf32>
    %126 = arith.negf %125 : vector<2x96xf32>
    %127 = math.exp %126 : vector<2x96xf32>
    %cst_46 = arith.constant 1.000000e+00 : f32
    %128 = vector.broadcast %cst_46 : f32 to vector<2x96xf32>
    %129 = arith.addf %128, %127 : vector<2x96xf32>
    %130 = arith.divf %128, %129 : vector<2x96xf32>
    %131 = vector.extract_strided_slice %124 {offsets = [0, 96], sizes = [2, 32], strides = [1, 1]} : vector<2x128xf32> to vector<2x32xf32>
    %132 = math.tanh %131 : vector<2x32xf32>
    %133 = vector.extract_strided_slice %130 {offsets = [0, 0], sizes = [2, 32], strides = [1, 1]} : vector<2x96xf32> to vector<2x32xf32>
    %134 = vector.extract_strided_slice %130 {offsets = [0, 32], sizes = [2, 32], strides = [1, 1]} : vector<2x96xf32> to vector<2x32xf32>
    %135 = vector.extract_strided_slice %130 {offsets = [0, 64], sizes = [2, 32], strides = [1, 1]} : vector<2x96xf32> to vector<2x32xf32>
    %136 = arith.mulf %134, %116 : vector<2x32xf32>
    %137 = arith.mulf %133, %132 : vector<2x32xf32>
    %138 = arith.addf %136, %137 : vector<2x32xf32>
    %139 = math.tanh %138 : vector<2x32xf32>
    %140 = arith.mulf %135, %139 : vector<2x32xf32>
    %c0_47 = arith.constant 0 : index
    %c5 = arith.constant 5 : index
    %c0_48 = arith.constant 0 : index
    %141 = vector.load %arg8[%c0_47, %c5, %c0_48] : memref<2x8x32xf32, #tpu.memory_space<vmem>>, vector<2x1x32xf32>
    %142 = vector.shape_cast %141 : vector<2x1x32xf32> to vector<2x32xf32>
    %143 = vector.shape_cast %140 : vector<2x32xf32> to vector<2x1x32xf32>
    tpu.vector_store %arg8[%c0_47, %c5, %c0_48], %143 {strides = array<i32>} : memref<2x8x32xf32, #tpu.memory_space<vmem>>, vector<2x1x32xf32>,
    %c12 = arith.constant 12 : index
    %c0_49 = arith.constant 0 : index
    %144 = vector.load %arg7[%c12, %c0_49] : memref<16x128xf32, #tpu.memory_space<vmem>>, vector<2x128xf32>
    %cst_50 = arith.constant dense<0.000000e+00> : vector<2x128xf32>
    %145 = tpu.matmul %140, %1, %cst_50 {dimension_numbers = #tpu.dot_dimension_numbers<[1], [0], [0], [1], [0, 0, 1, 1], [], []>} : vector<2x32xf32>, vector<32x128xf32>, vector<2x128xf32> -> vector<2x128xf32>
    %146 = arith.addf %144, %145 : vector<2x128xf32>
    %147 = vector.extract_strided_slice %146 {offsets = [0, 0], sizes = [2, 96], strides = [1, 1]} : vector<2x128xf32> to vector<2x96xf32>
    %148 = arith.negf %147 : vector<2x96xf32>
    %149 = math.exp %148 : vector<2x96xf32>
    %cst_51 = arith.constant 1.000000e+00 : f32
    %150 = vector.broadcast %cst_51 : f32 to vector<2x96xf32>
    %151 = arith.addf %150, %149 : vector<2x96xf32>
    %152 = arith.divf %150, %151 : vector<2x96xf32>
    %153 = vector.extract_strided_slice %146 {offsets = [0, 96], sizes = [2, 32], strides = [1, 1]} : vector<2x128xf32> to vector<2x32xf32>
    %154 = math.tanh %153 : vector<2x32xf32>
    %155 = vector.extract_strided_slice %152 {offsets = [0, 0], sizes = [2, 32], strides = [1, 1]} : vector<2x96xf32> to vector<2x32xf32>
    %156 = vector.extract_strided_slice %152 {offsets = [0, 32], sizes = [2, 32], strides = [1, 1]} : vector<2x96xf32> to vector<2x32xf32>
    %157 = vector.extract_strided_slice %152 {offsets = [0, 64], sizes = [2, 32], strides = [1, 1]} : vector<2x96xf32> to vector<2x32xf32>
    %158 = arith.mulf %156, %138 : vector<2x32xf32>
    %159 = arith.mulf %155, %154 : vector<2x32xf32>
    %160 = arith.addf %158, %159 : vector<2x32xf32>
    %161 = math.tanh %160 : vector<2x32xf32>
    %162 = arith.mulf %157, %161 : vector<2x32xf32>
    %c0_52 = arith.constant 0 : index
    %c6_53 = arith.constant 6 : index
    %c0_54 = arith.constant 0 : index
    %163 = vector.load %arg8[%c0_52, %c6_53, %c0_54] : memref<2x8x32xf32, #tpu.memory_space<vmem>>, vector<2x1x32xf32>
    %164 = vector.shape_cast %163 : vector<2x1x32xf32> to vector<2x32xf32>
    %165 = vector.shape_cast %162 : vector<2x32xf32> to vector<2x1x32xf32>
    tpu.vector_store %arg8[%c0_52, %c6_53, %c0_54], %165 {strides = array<i32>} : memref<2x8x32xf32, #tpu.memory_space<vmem>>, vector<2x1x32xf32>,
    %c14 = arith.constant 14 : index
    %c0_55 = arith.constant 0 : index
    %166 = vector.load %arg7[%c14, %c0_55] : memref<16x128xf32, #tpu.memory_space<vmem>>, vector<2x128xf32>
    %cst_56 = arith.constant dense<0.000000e+00> : vector<2x128xf32>
    %167 = tpu.matmul %162, %1, %cst_56 {dimension_numbers = #tpu.dot_dimension_numbers<[1], [0], [0], [1], [0, 0, 1, 1], [], []>} : vector<2x32xf32>, vector<32x128xf32>, vector<2x128xf32> -> vector<2x128xf32>
    %168 = arith.addf %166, %167 : vector<2x128xf32>
    %169 = vector.extract_strided_slice %168 {offsets = [0, 0], sizes = [2, 96], strides = [1, 1]} : vector<2x128xf32> to vector<2x96xf32>
    %170 = arith.negf %169 : vector<2x96xf32>
    %171 = math.exp %170 : vector<2x96xf32>
    %cst_57 = arith.constant 1.000000e+00 : f32
    %172 = vector.broadcast %cst_57 : f32 to vector<2x96xf32>
    %173 = arith.addf %172, %171 : vector<2x96xf32>
    %174 = arith.divf %172, %173 : vector<2x96xf32>
    %175 = vector.extract_strided_slice %168 {offsets = [0, 96], sizes = [2, 32], strides = [1, 1]} : vector<2x128xf32> to vector<2x32xf32>
    %176 = math.tanh %175 : vector<2x32xf32>
    %177 = vector.extract_strided_slice %174 {offsets = [0, 0], sizes = [2, 32], strides = [1, 1]} : vector<2x96xf32> to vector<2x32xf32>
    %178 = vector.extract_strided_slice %174 {offsets = [0, 32], sizes = [2, 32], strides = [1, 1]} : vector<2x96xf32> to vector<2x32xf32>
    %179 = vector.extract_strided_slice %174 {offsets = [0, 64], sizes = [2, 32], strides = [1, 1]} : vector<2x96xf32> to vector<2x32xf32>
    %180 = arith.mulf %178, %160 : vector<2x32xf32>
    %181 = arith.mulf %177, %176 : vector<2x32xf32>
    %182 = arith.addf %180, %181 : vector<2x32xf32>
    %183 = math.tanh %182 : vector<2x32xf32>
    %184 = arith.mulf %179, %183 : vector<2x32xf32>
    %c0_58 = arith.constant 0 : index
    %c7 = arith.constant 7 : index
    %c0_59 = arith.constant 0 : index
    %185 = vector.load %arg8[%c0_58, %c7, %c0_59] : memref<2x8x32xf32, #tpu.memory_space<vmem>>, vector<2x1x32xf32>
    %186 = vector.shape_cast %185 : vector<2x1x32xf32> to vector<2x32xf32>
    %187 = vector.shape_cast %184 : vector<2x32xf32> to vector<2x1x32xf32>
    tpu.vector_store %arg8[%c0_58, %c7, %c0_59], %187 {strides = array<i32>} : memref<2x8x32xf32, #tpu.memory_space<vmem>>, vector<2x1x32xf32>,
    %c0_60 = arith.constant 0 : index
    %c0_61 = arith.constant 0 : index
    %c0_62 = arith.constant 0 : index
    %188 = vector.load %arg8[%c0_60, %c0_61, %c0_62] : memref<2x8x32xf32, #tpu.memory_space<vmem>>, vector<2x8x32xf32>
    %189 = vector.shape_cast %188 : vector<2x8x32xf32> to vector<16x32xf32>
    %cst_63 = arith.constant dense<0.000000e+00> : vector<16x8xf32>
    %190 = tpu.matmul %189, %3, %cst_63 {dimension_numbers = #tpu.dot_dimension_numbers<[1], [0], [0], [1], [0, 0, 1, 1], [], []>} : vector<16x32xf32>, vector<32x8xf32>, vector<16x8xf32> -> vector<16x8xf32>
    %191 = vector.broadcast %4 : vector<1x8xf32> to vector<16x8xf32>
    %192 = arith.addf %190, %191 : vector<16x8xf32>
    %c0_64 = arith.constant 0 : index
    %c0_65 = arith.constant 0 : index
    %193 = vector.load %arg6[%c0_64, %c0_65] : memref<16x8xf32, #tpu.memory_space<vmem>>, vector<16x8xf32>
    tpu.vector_store %arg6[%c0_64, %c0_65], %192 {strides = array<i32>} : memref<16x8xf32, #tpu.memory_space<vmem>>, vector<16x8xf32>,
    return
  }
}

</mosaic_0001>

<bundles_post_ra>
// kernel: skeleton_action_forward.1
= control target key start
LH: loop header
LB: loop body
LE: loop exit
PB: predicated region body
PF: predicated region fallthrough
CT: control target
= control target key end

     0   :  { %vm47_vm0 = vcmask 1043456   ;;  %vm40_vm1 = vcmask 31744   ;;  %s1090_s0 = inlined_call_operand.vmem [shape: f32[16,4], index: 0, kind: input, shape index: {}]   ;;  %s1091_s1 = inlined_call_operand.vmem [shape: f32[4,128], index: 1, kind: input, shape index: {}]   ;;  %s1092_s2 = inlined_call_operand.vmem [shape: f32[32,128], index: 2, kind: input, shape index: {}]   ;;  %s1093_s3 = inlined_call_operand.vmem [shape: f32[1,128], index: 3, kind: input, shape index: {}]   ;;  %s1094_s4 = inlined_call_operand.vmem [shape: f32[32,8], index: 4, kind: input, shape index: {}]   ;;  %s1095_s5 = inlined_call_operand.vmem [shape: f32[1,8], index: 5, kind: input, shape index: {}]   ;;  %s1096_s6 = inlined_call_operand.hbm [shape: f32[16,8], index: 6, kind: output, shape index: {}]  }
   0x1   :  { %v24_v0 = vld [vmem:[%s1091_s1] sm:$0xf]  ;;  %v900_v2 = vld [vmem:[%s1092_s2 + $0x18] sm:$0xff]  ;;  %v906_v3 = vld [vmem:[%s1092_s2 + $0x10] sm:$0xff] }
   0x2   :  { %v35_v1 = vld [vmem:[%s1090_s0] sm:$0xff]  ;;  %732 = vmatpush.msk.msra.mxu0 %vm47_vm0, %v24_v0  ;;  %93 = vmatpush.msra.mxu1 %v900_v2  ;;  %v912_v4 = vld [vmem:[%s1092_s2 + $0x8] sm:$0xff] }
   0x3   :  { %733 = vmatmul.msk.f32.vlgmr.msra.gmra.mxu0 %vm40_vm1, %v35_v1  ;;  %169 = vmatpush.msra.mxu3 %v900_v2 }
   0x4   :  { %94 = vmatpush.msra.mxu1 %v906_v3  ;;  %394 = vmatpush.msra.mxu2 %v900_v2 }
   0x5   :  { %11 = vsyncpa [#allocation5], 0  ;;  %v920_v5 = vld [vmem:[%s1092_s2] sm:$0xff]  ;;  %170 = vmatpush.msra.mxu3 %v906_v3  ;;  %544 = vmatpush.msrb.mxu0 %v900_v2  ;;  %v850_v6 = vmov 0.0   ;;  %s851_s9 = smov 32   ;;  %vm77_vm6 = vcmask 261120  }
   0x6   :  { %95 = vmatpush.msra.mxu1 %v912_v4  ;;  %395 = vmatpush.msra.mxu2 %v906_v3  ;;  %v949_v7 = vld [vmem:[%s1093_s3] ss:$0 sm:$0xff]  ;;  %s852_s3 = smov 64   ;;  %s720_s24 = sshll.u32 %s1096_s6, 4  ;;  %s721_s24 = int_to_ptr.hbm [resolvable:$true] %s720_s24 }
   0x7   :  { %171 = vmatpush.msra.mxu3 %v912_v4  ;;  %545 = vmatpush.msrb.mxu0 %v906_v3  ;;  %s854_s25 = smov 128   ;;  %s855_s26 = smov 8  }
   0x8   :  { %96 = vmatpush.msra.mxu1 %v920_v5  ;;  %396 = vmatpush.msra.mxu2 %v912_v4 }
   0x9   :  { %97 = vmatmul.f32.vlgmr.msra.gmra.mxu1 %v850_v6  ;;  %172 = vmatpush.msra.mxu3 %v920_v5 }
   0xa   :  { %319 = vmatpush.msrb.mxu1 %v900_v2  ;;  %397 = vmatpush.msra.mxu2 %v920_v5 }
   0xb   :  { %244 = vmatpush.msrb.mxu3 %v900_v2  ;;  %546 = vmatpush.msrb.mxu0 %v912_v4 }
   0xc   :  { %320 = vmatpush.msrb.mxu1 %v906_v3 }
   0xd   :  { %245 = vmatpush.msrb.mxu3 %v906_v3  ;;  %547 = vmatpush.msrb.mxu0 %v920_v5 }
   0xe   :  { %321 = vmatpush.msrb.mxu1 %v912_v4 }
   0xf   :  { %246 = vmatpush.msrb.mxu3 %v912_v4 }
  0x10   :  { %322 = vmatpush.msrb.mxu1 %v920_v5 }
  0x11   :  { %247 = vmatpush.msrb.mxu3 %v920_v5 }
  0x12   :  { %619 = vmatpush.msra.mxu1 %v900_v2 }
  0x14   :  { %620 = vmatpush.msra.mxu1 %v906_v3 }
  0x16   :  { %621 = vmatpush.msra.mxu1 %v912_v4 }
  0x18   :  { %622 = vmatpush.msra.mxu1 %v920_v5 }
  0x80   :  { %v68_v8 = vpop.f32.mrf.mxu0 }
  0x81   :  { %v69_v9 = vadd.f32 %v949_v7, %v68_v8 }
  0x83   :  { %74 = vst [vmem:[#allocation2] sm:$0xff] %v69_v9 }
  0x86   :  { %v98_v10 = vpop.f32.mrf.mxu1 }
  0x8a   :  { %v76_v11 = vld [vmem:[#allocation2] sm:$0x3]  ;;  %v152_v36 = vld [vmem:[#allocation2 + $0x2] sm:$0x3]  ;;  %v227_v62 = vld [vmem:[#allocation2 + $0x4] sm:$0x3] }
  0x8b   :  { %v101_v12 = vadd.f32 %v98_v10, %v76_v11 }
  0x8d   :  { %760 = vtanh.f32 %v101_v12  ;;  %v735_v14 = vmul.f32 -1.442695, %v101_v12 }
  0x8f   :  { %762 = vpow2.f32 %v735_v14 }
  0x93   :  { %v761_v13 = vpop.eup %760 }
  0x94   :  { %124 = vrot.lane.b32.xlu0 %v761_v13, %s851_s9 }
  0x95   :  { %v763_v15 = vpop.eup %762 }
  0x96   :  { %v105_v16 = vadd.f32 1.0, %v763_v15 }
  0x98   :  { %764 = vrcp.f32 %v105_v16  ;;  %v117_v22 = vand.u32 2147483648, %v105_v16  ;;  %vm111_vm3 = vweird.f32 %v105_v16  ;;  %v115_v23 = vand.u32 2147483647, %v105_v16 }
  0x9a   :  { %v118_v25 = vor.u32 1.1754944e-38, %v117_v22  ;;  %vm116_vm5 = vcmp.eq.f32.partialorder %v115_v23, 8.507059e+37 }
  0x9e   :  { %v765_v17 = vpop.eup %764 }
  0x9f   :  { %v107_v18 = vmul.f32 %v765_v17, %v105_v16  ;;  %vm112_vm2 = vweird.f32 %v765_v17 }
  0xa0   :  { %vm113_vm4 = vmor %vm111_vm3, %vm112_vm2 }
  0xa1   :  { %v108_v19 = vsub.f32 1.0, %v107_v18 }
  0xa3   :  { %v109_v20 = vmul.f32 %v765_v17, %v108_v19 }
  0xa5   :  { %v110_v21 = vadd.f32 %v765_v17, %v109_v20 }
  0xa7   :  { %v114_v24 = vsel %vm113_vm4, %v765_v17, %v110_v21 }
  0xa8   :  { %v119_v27 = vsel %vm116_vm5, %v118_v25, %v114_v24  ;;  %v302_v25 = vld [vmem:[#allocation2 + $0x6] sm:$0x3] }
  0xa9   :  { %v122_v29 = vmul.f32 0.0, %v119_v27 }
 0x106   :  { %v125_v26 = vpop.permute.xlu0 %124 }
 0x107   :  { %v127_v28 = vmul.f32 %v125_v26, %v119_v27 }
 0x109   :  { %129 = vrot.lane.b32.xlu0 %v127_v28, %s851_s9 }
 0x17b   :  { %v130_v30 = vpop.permute.xlu0 %129 }
 0x17c   :  { %v132_v31 = vadd.f32 %v130_v30, %v122_v29 }
 0x17e   :  { %766 = vtanh.f32 %v132_v31 }
 0x184   :  { %v767_v32 = vpop.eup %766 }
 0x185   :  { %135 = vrot.lane.b32.xlu1 %v767_v32, %s851_s9 }
 0x1f7   :  { %v136_v33 = vpop.permute.xlu1 %135 }
 0x1f8   :  { %v955_v34 = vmul.f32 %v136_v33, %v119_v27 }
 0x1fa   :  { %153 = vrot.lane.b32.xlu1 %v955_v34, %s852_s3 }
 0x26c   :  { %v154_v35 = vpop.permute.xlu1 %153 }
 0x26d   :  { %736 = vmatmul.msk.f32.vlgmr.msra.gmra.mxu3 %vm77_vm6, %v154_v35 }
 0x26e   :  { %469 = vmatpush.msra.mxu3 %v900_v2 }
 0x270   :  { %470 = vmatpush.msra.mxu3 %v906_v3 }
 0x272   :  { %471 = vmatpush.msra.mxu3 %v912_v4 }
 0x274   :  { %472 = vmatpush.msra.mxu3 %v920_v5 }
 0x2f0   :  { %v174_v37 = vpop.f32.mrf.mxu3 }
 0x2f1   :  { %v177_v38 = vadd.f32 %v174_v37, %v152_v36 }
 0x2f3   :  { %768 = vtanh.f32 %v177_v38  ;;  %v737_v40 = vmul.f32 -1.442695, %v177_v38 }
 0x2f5   :  { %770 = vpow2.f32 %v737_v40 }
 0x2f9   :  { %v769_v39 = vpop.eup %768 }
 0x2fa   :  { %200 = vrot.lane.b32.xlu2 %v769_v39, %s851_s9 }
 0x2fb   :  { %v771_v41 = vpop.eup %770 }
 0x2fc   :  { %v181_v42 = vadd.f32 1.0, %v771_v41 }
 0x2fe   :  { %772 = vrcp.f32 %v181_v42  ;;  %v193_v48 = vand.u32 2147483648, %v181_v42  ;;  %vm187_vm8 = vweird.f32 %v181_v42  ;;  %v191_v49 = vand.u32 2147483647, %v181_v42 }
 0x300   :  { %v194_v51 = vor.u32 1.1754944e-38, %v193_v48  ;;  %vm192_vm10 = vcmp.eq.f32.partialorder %v191_v49, 8.507059e+37  ;;  %v36_v49 = vld [vmem:[%s1090_s0 + $0x8] sm:$0xff] }
 0x301   :  { %734 = vmatmul.msk.f32.gmra.mxu0 %vm40_vm1, %v36_v49 }
 0x304   :  { %v773_v43 = vpop.eup %772 }
 0x305   :  { %v183_v44 = vmul.f32 %v773_v43, %v181_v42  ;;  %vm188_vm7 = vweird.f32 %v773_v43 }
 0x306   :  { %vm189_vm9 = vmor %vm187_vm8, %vm188_vm7 }
 0x307   :  { %v184_v45 = vsub.f32 1.0, %v183_v44 }
 0x309   :  { %v185_v46 = vmul.f32 %v773_v43, %v184_v45 }
 0x30b   :  { %v186_v47 = vadd.f32 %v773_v43, %v185_v46 }
 0x30d   :  { %v190_v50 = vsel %vm189_vm9, %v773_v43, %v186_v47 }
 0x30e   :  { %v195_v53 = vsel %vm192_vm10, %v194_v51, %v190_v50 }
 0x30f   :  { %v198_v55 = vmul.f32 %v195_v53, %v132_v31 }
 0x354   :  { %v201_v52 = vpop.permute.xlu2 %200 }
 0x355   :  { %v203_v54 = vmul.f32 %v201_v52, %v195_v53 }
 0x357   :  { %205 = vrot.lane.b32.xlu2 %v203_v54, %s851_s9 }
 0x37e   :  { %v71_v52 = vpop.f32.mrf.mxu0 }
 0x3b1   :  { %v206_v56 = vpop.permute.xlu2 %205 }
 0x3b2   :  { %v208_v57 = vadd.f32 %v206_v56, %v198_v55 }
 0x3b4   :  { %774 = vtanh.f32 %v208_v57 }
 0x3ba   :  { %v775_v58 = vpop.eup %774 }
 0x3bb   :  { %211 = vrot.lane.b32.xlu0 %v775_v58, %s851_s9 }
 0x42d   :  { %v212_v59 = vpop.permute.xlu0 %211 }
 0x42e   :  { %v967_v60 = vmul.f32 %v212_v59, %v195_v53  ;;  %v72_v53 = vadd.f32 %v949_v7, %v71_v52 }
 0x430   :  { %228 = vrot.lane.b32.xlu1 %v967_v60, %s852_s3  ;;  %75 = vst [vmem:[#allocation2 + $0x8] sm:$0xff] %v72_v53 }
 0x437   :  { %v377_v55 = vld [vmem:[#allocation2 + $0x8] sm:$0x3] }
 0x4a2   :  { %v229_v61 = vpop.permute.xlu1 %228 }
 0x4a3   :  { %738 = vmatmul.msk.f32.vlgmr.msrb.gmra.mxu3 %vm77_vm6, %v229_v61 }
 0x526   :  { %v249_v63 = vpop.f32.mrf.mxu3 }
 0x527   :  { %v252_v0 = vadd.f32 %v249_v63, %v227_v62 }
 0x529   :  { %776 = vtanh.f32 %v252_v0  ;;  %v739_v2 = vmul.f32 -1.442695, %v252_v0 }
 0x52b   :  { %778 = vpow2.f32 %v739_v2 }
 0x52f   :  { %v777_v1 = vpop.eup %776 }
 0x530   :  { %275 = vrot.lane.b32.xlu2 %v777_v1, %s851_s9 }
 0x531   :  { %v779_v3 = vpop.eup %778 }
 0x532   :  { %v256_v4 = vadd.f32 1.0, %v779_v3 }
 0x534   :  { %780 = vrcp.f32 %v256_v4  ;;  %v268_v11 = vand.u32 2147483648, %v256_v4  ;;  %vm262_vm12 = vweird.f32 %v256_v4  ;;  %v266_v12 = vand.u32 2147483647, %v256_v4 }
 0x536   :  { %v269_v14 = vor.u32 1.1754944e-38, %v268_v11  ;;  %vm267_vm14 = vcmp.eq.f32.partialorder %v266_v12, 8.507059e+37 }
 0x53a   :  { %v781_v5 = vpop.eup %780 }
 0x53b   :  { %v258_v6 = vmul.f32 %v781_v5, %v256_v4  ;;  %vm263_vm11 = vweird.f32 %v781_v5 }
 0x53c   :  { %vm264_vm13 = vmor %vm262_vm12, %vm263_vm11 }
 0x53d   :  { %v259_v8 = vsub.f32 1.0, %v258_v6 }
 0x53f   :  { %v260_v9 = vmul.f32 %v781_v5, %v259_v8 }
 0x541   :  { %v261_v10 = vadd.f32 %v781_v5, %v260_v9 }
 0x543   :  { %v265_v13 = vsel %vm264_vm13, %v781_v5, %v261_v10 }
 0x544   :  { %v270_v16 = vsel %vm267_vm14, %v269_v14, %v265_v13 }
 0x545   :  { %v273_v18 = vmul.f32 %v270_v16, %v208_v57 }
 0x58a   :  { %v276_v15 = vpop.permute.xlu2 %275 }
 0x58b   :  { %v278_v17 = vmul.f32 %v276_v15, %v270_v16 }
 0x58d   :  { %280 = vrot.lane.b32.xlu0 %v278_v17, %s851_s9 }
 0x5ff   :  { %v281_v19 = vpop.permute.xlu0 %280 }
 0x600   :  { %v283_v20 = vadd.f32 %v281_v19, %v273_v18  ;;  %v452_v18 = vld [vmem:[#allocation2 + $0xa] sm:$0x3] }
 0x602   :  { %782 = vtanh.f32 %v283_v20 }
 0x608   :  { %v783_v21 = vpop.eup %782 }
 0x609   :  { %286 = vrot.lane.b32.xlu1 %v783_v21, %s851_s9 }
 0x67b   :  { %v287_v22 = vpop.permute.xlu1 %286 }
 0x67c   :  { %v975_v23 = vmul.f32 %v287_v22, %v270_v16 }
 0x67e   :  { %303 = vrot.lane.b32.xlu2 %v975_v23, %s852_s3 }
 0x6d8   :  { %v304_v24 = vpop.permute.xlu2 %303 }
 0x6d9   :  { %740 = vmatmul.msk.f32.vlgmr.msrb.gmra.mxu1 %vm77_vm6, %v304_v24 }
 0x756   :  { %v324_v26 = vpop.f32.mrf.mxu1 }
 0x757   :  { %v327_v27 = vadd.f32 %v324_v26, %v302_v25 }
 0x759   :  { %784 = vtanh.f32 %v327_v27  ;;  %v741_v29 = vmul.f32 -1.442695, %v327_v27 }
 0x75b   :  { %786 = vpow2.f32 %v741_v29 }
 0x75f   :  { %v785_v28 = vpop.eup %784 }
 0x760   :  { %350 = vrot.lane.b32.xlu0 %v785_v28, %s851_s9 }
 0x761   :  { %v787_v30 = vpop.eup %786 }
 0x762   :  { %v331_v31 = vadd.f32 1.0, %v787_v30 }
 0x764   :  { %788 = vrcp.f32 %v331_v31  ;;  %v343_v38 = vand.u32 2147483648, %v331_v31  ;;  %vm337_vm0 = vweird.f32 %v331_v31  ;;  %v341_v39 = vand.u32 2147483647, %v331_v31 }
 0x766   :  { %v344_v41 = vor.u32 1.1754944e-38, %v343_v38  ;;  %vm342_vm3 = vcmp.eq.f32.partialorder %v341_v39, 8.507059e+37 }
 0x76a   :  { %v789_v32 = vpop.eup %788 }
 0x76b   :  { %v333_v33 = vmul.f32 %v789_v32, %v331_v31  ;;  %vm338_vm15 = vweird.f32 %v789_v32 }
 0x76c   :  { %vm339_vm2 = vmor %vm337_vm0, %vm338_vm15 }
 0x76d   :  { %v334_v35 = vsub.f32 1.0, %v333_v33 }
 0x76f   :  { %v335_v36 = vmul.f32 %v789_v32, %v334_v35 }
 0x771   :  { %v336_v37 = vadd.f32 %v789_v32, %v335_v36 }
 0x773   :  { %v340_v40 = vsel %vm339_vm2, %v789_v32, %v336_v37 }
 0x774   :  { %v345_v43 = vsel %vm342_vm3, %v344_v41, %v340_v40 }
 0x775   :  { %v348_v45 = vmul.f32 %v345_v43, %v283_v20 }
 0x7d2   :  { %v351_v42 = vpop.permute.xlu0 %350 }
 0x7d3   :  { %v353_v44 = vmul.f32 %v351_v42, %v345_v43 }
 0x7d5   :  { %355 = vrot.lane.b32.xlu1 %v353_v44, %s851_s9 }
 0x847   :  { %v356_v46 = vpop.permute.xlu1 %355 }
 0x848   :  { %v358_v47 = vadd.f32 %v356_v46, %v348_v45  ;;  %v527_v46 = vld [vmem:[#allocation2 + $0xc] sm:$0x3] }
 0x84a   :  { %790 = vtanh.f32 %v358_v47 }
 0x850   :  { %v791_v48 = vpop.eup %790 }
 0x851   :  { %361 = vrot.lane.b32.xlu2 %v791_v48, %s851_s9 }
 0x8ab   :  { %v362_v50 = vpop.permute.xlu2 %361 }
 0x8ac   :  { %v987_v51 = vmul.f32 %v362_v50, %v345_v43 }
 0x8ae   :  { %378 = vrot.lane.b32.xlu0 %v987_v51, %s852_s3 }
 0x920   :  { %v379_v54 = vpop.permute.xlu0 %378 }
 0x921   :  { %742 = vmatmul.msk.f32.vlgmr.msra.gmra.mxu2 %vm77_vm6, %v379_v54 }
 0x9a4   :  { %v399_v56 = vpop.f32.mrf.mxu2 }
 0x9a5   :  { %v402_v57 = vadd.f32 %v399_v56, %v377_v55 }
 0x9a7   :  { %792 = vtanh.f32 %v402_v57  ;;  %v743_v59 = vmul.f32 -1.442695, %v402_v57 }
 0x9a9   :  { %794 = vpow2.f32 %v743_v59 }
 0x9ad   :  { %v793_v58 = vpop.eup %792 }
 0x9ae   :  { %425 = vrot.lane.b32.xlu1 %v793_v58, %s851_s9 }
 0x9af   :  { %v795_v61 = vpop.eup %794 }
 0x9b0   :  { %v406_v62 = vadd.f32 1.0, %v795_v61 }
 0x9b2   :  { %796 = vrcp.f32 %v406_v62  ;;  %v418_v3 = vand.u32 2147483648, %v406_v62  ;;  %vm412_vm4 = vweird.f32 %v406_v62  ;;  %v416_v4 = vand.u32 2147483647, %v406_v62 }
 0x9b4   :  { %v419_v6 = vor.u32 1.1754944e-38, %v418_v3  ;;  %vm417_vm7 = vcmp.eq.f32.partialorder %v416_v4, 8.507059e+37 }
 0x9b8   :  { %v797_v63 = vpop.eup %796 }
 0x9b9   :  { %v408_v0 = vmul.f32 %v797_v63, %v406_v62  ;;  %vm413_vm1 = vweird.f32 %v797_v63 }
 0x9ba   :  { %vm414_vm5 = vmor %vm412_vm4, %vm413_vm1  ;;  %vm149_vm4 = vcmask 253952  }
 0x9bb   :  { %v409_v1 = vsub.f32 1.0, %v408_v0 }
 0x9bd   :  { %v410_v7 = vmul.f32 %v797_v63, %v409_v1 }
 0x9bf   :  { %v411_v2 = vadd.f32 %v797_v63, %v410_v7 }
 0x9c1   :  { %v415_v5 = vsel %vm414_vm5, %v797_v63, %v411_v2  ;;  %vm711_vm5 = vcmask 64512  }
 0x9c2   :  { %v420_v9 = vsel %vm417_vm7, %v419_v6, %v415_v5 }
 0x9c3   :  { %v423_v11 = vmul.f32 %v420_v9, %v358_v47 }
 0xa20   :  { %v426_v8 = vpop.permute.xlu1 %425 }
 0xa21   :  { %v428_v10 = vmul.f32 %v426_v8, %v420_v9 }
 0xa23   :  { %430 = vrot.lane.b32.xlu2 %v428_v10, %s851_s9  ;;  %v602_v10 = vld [vmem:[#allocation2 + $0xe] sm:$0x3] }
 0xa7d   :  { %v431_v12 = vpop.permute.xlu2 %430 }
 0xa7e   :  { %v433_v13 = vadd.f32 %v431_v12, %v423_v11 }
 0xa80   :  { %798 = vtanh.f32 %v433_v13 }
 0xa86   :  { %v799_v14 = vpop.eup %798 }
 0xa87   :  { %436 = vrot.lane.b32.xlu0 %v799_v14, %s851_s9  ;;  %v141_v14 = vperm.slane %v955_v34, 0 }
 0xaf9   :  { %v437_v15 = vpop.permute.xlu0 %436 }
 0xafa   :  { %v996_v16 = vmul.f32 %v437_v15, %v420_v9  ;;  %v367_v15 = vperm.slane %v987_v51, 0 }
 0xafc   :  { %453 = vrot.lane.b32.xlu1 %v996_v16, %s852_s3 }
 0xb6e   :  { %v454_v17 = vpop.permute.xlu1 %453 }
 0xb6f   :  { %744 = vmatmul.msk.f32.vlgmr.msra.gmra.mxu3 %vm77_vm6, %v454_v17 }
 0xbf2   :  { %v474_v19 = vpop.f32.mrf.mxu3 }
 0xbf3   :  { %v477_v20 = vadd.f32 %v474_v19, %v452_v18  ;;  %v216_v18 = vrot.slane %v967_v60, 1 }
 0xbf5   :  { %800 = vtanh.f32 %v477_v20  ;;  %v745_v22 = vmul.f32 -1.442695, %v477_v20  ;;  %v218_v19 = vperm.slane %v216_v18, 0  ;;  %v441_v20 = vrot.slane %v996_v16, 1  ;;  %v759_v18 = vld [vmem:[%s1095_s5] ss:$0 sm:$0xff] }
 0xbf7   :  { %802 = vpow2.f32 %v745_v22 }
 0xbfb   :  { %v801_v21 = vpop.eup %800 }
 0xbfc   :  { %500 = vrot.lane.b32.xlu2 %v801_v21, %s851_s9  ;;  %v443_v21 = vperm.slane %v441_v20, 0 }
 0xbfd   :  { %v803_v24 = vpop.eup %802 }
 0xbfe   :  { %v481_v25 = vadd.f32 1.0, %v803_v24 }
 0xc00   :  { %804 = vrcp.f32 %v481_v25  ;;  %v493_v31 = vand.u32 2147483648, %v481_v25  ;;  %vm487_vm9 = vweird.f32 %v481_v25  ;;  %v491_v32 = vand.u32 2147483647, %v481_v25 }
 0xc02   :  { %v494_v35 = vor.u32 1.1754944e-38, %v493_v31  ;;  %vm492_vm11 = vcmp.eq.f32.partialorder %v491_v32, 8.507059e+37 }
 0xc06   :  { %v805_v26 = vpop.eup %804 }
 0xc07   :  { %v483_v27 = vmul.f32 %v805_v26, %v481_v25  ;;  %vm488_vm8 = vweird.f32 %v805_v26 }
 0xc08   :  { %vm489_vm10 = vmor %vm487_vm9, %vm488_vm8 }
 0xc09   :  { %v484_v28 = vsub.f32 1.0, %v483_v27 }
 0xc0b   :  { %v485_v29 = vmul.f32 %v805_v26, %v484_v28 }
 0xc0d   :  { %v486_v30 = vadd.f32 %v805_v26, %v485_v29 }
 0xc0f   :  { %v490_v33 = vsel %vm489_vm10, %v805_v26, %v486_v30 }
 0xc10   :  { %v495_v37 = vsel %vm492_vm11, %v494_v35, %v490_v33 }
 0xc11   :  { %v498_v39 = vmul.f32 %v495_v37, %v433_v13 }
 0xc56   :  { %v501_v36 = vpop.permute.xlu2 %500 }
 0xc57   :  { %v503_v38 = vmul.f32 %v501_v36, %v495_v37 }
 0xc59   :  { %505 = vrot.lane.b32.xlu0 %v503_v38, %s851_s9 }
 0xccb   :  { %v506_v40 = vpop.permute.xlu0 %505 }
 0xccc   :  { %v508_v41 = vadd.f32 %v506_v40, %v498_v39  ;;  %v217_v40 = vperm.slane %v967_v60, 0 }
 0xcce   :  { %806 = vtanh.f32 %v508_v41 }
 0xcd4   :  { %v807_v42 = vpop.eup %806 }
 0xcd5   :  { %511 = vrot.lane.b32.xlu1 %v807_v42, %s851_s9  ;;  %v442_v42 = vperm.slane %v996_v16, 0 }
 0xd47   :  { %v512_v43 = vpop.permute.xlu1 %511 }
 0xd48   :  { %v1004_v44 = vmul.f32 %v512_v43, %v495_v37  ;;  %v291_v43 = vrot.slane %v975_v23, 1 }
 0xd4a   :  { %528 = vrot.lane.b32.xlu2 %v1004_v44, %s852_s3 }
 0xda4   :  { %v529_v45 = vpop.permute.xlu2 %528 }
 0xda5   :  { %746 = vmatmul.msk.f32.vlgmr.msrb.gmra.mxu0 %vm77_vm6, %v529_v45 }
 0xe22   :  { %v549_v47 = vpop.f32.mrf.mxu0 }
 0xe23   :  { %v552_v48 = vadd.f32 %v549_v47, %v527_v46  ;;  %v293_v46 = vperm.slane %v291_v43, 0 }
 0xe25   :  { %808 = vtanh.f32 %v552_v48  ;;  %v747_v50 = vmul.f32 -1.442695, %v552_v48 }
 0xe27   :  { %810 = vpow2.f32 %v747_v50 }
 0xe2b   :  { %v809_v49 = vpop.eup %808 }
 0xe2c   :  { %575 = vrot.lane.b32.xlu0 %v809_v49, %s851_s9 }
 0xe2d   :  { %v811_v52 = vpop.eup %810 }
 0xe2e   :  { %v556_v53 = vadd.f32 1.0, %v811_v52 }
 0xe30   :  { %812 = vrcp.f32 %v556_v53  ;;  %v568_v59 = vand.u32 2147483648, %v556_v53  ;;  %vm562_vm13 = vweird.f32 %v556_v53  ;;  %v566_v61 = vand.u32 2147483647, %v556_v53 }
 0xe32   :  { %v569_v63 = vor.u32 1.1754944e-38, %v568_v59  ;;  %vm567_vm15 = vcmp.eq.f32.partialorder %v566_v61, 8.507059e+37  ;;  %v366_v59 = vrot.slane %v987_v51, 1 }
 0xe34   :  { %v368_v61 = vperm.slane %v366_v59, 0 }
 0xe36   :  { %v813_v54 = vpop.eup %812 }
 0xe37   :  { %v558_v55 = vmul.f32 %v813_v54, %v556_v53  ;;  %vm563_vm12 = vweird.f32 %v813_v54 }
 0xe38   :  { %vm564_vm14 = vmor %vm562_vm13, %vm563_vm12 }
 0xe39   :  { %v559_v56 = vsub.f32 1.0, %v558_v55 }
 0xe3b   :  { %v560_v57 = vmul.f32 %v813_v54, %v559_v56  ;;  %v517_v56 = vperm.slane %v1004_v44, 0 }
 0xe3d   :  { %v561_v58 = vadd.f32 %v813_v54, %v560_v57  ;;  %v140_v57 = vrot.slane %v955_v34, 1  ;;  %v516_v34 = vrot.slane %v1004_v44, 1  ;;  %v33_v44 = vld [vmem:[%s1094_s4 + $0x18] sm:$0xff] }
 0xe3e   :  { %700 = vmatpush.msrb.mxu2 %v33_v44 }
 0xe3f   :  { %v565_v62 = vsel %vm564_vm14, %v813_v54, %v561_v58  ;;  %v292_v54 = vperm.slane %v975_v23, 0  ;;  %v142_v58 = vperm.slane %v140_v57, 0 }
 0xe40   :  { %v570_v1 = vsel %vm567_vm15, %v569_v63, %v565_v62 }
 0xe41   :  { %v573_v2 = vmul.f32 %v570_v1, %v508_v41 }
 0xe9e   :  { %v576_v0 = vpop.permute.xlu0 %575 }
 0xe9f   :  { %v578_v7 = vmul.f32 %v576_v0, %v570_v1 }
 0xea1   :  { %580 = vrot.lane.b32.xlu1 %v578_v7, %s851_s9 }
 0xf13   :  { %v581_v3 = vpop.permute.xlu1 %580 }
 0xf14   :  { %v1011_v4 = vadd.f32 %v581_v3, %v573_v2  ;;  %v518_v3 = vperm.slane %v516_v34, 0 }
 0xf16   :  { %814 = vtanh.f32 %v1011_v4 }
 0xf1c   :  { %v815_v5 = vpop.eup %814 }
 0xf1d   :  { %586 = vrot.lane.b32.xlu2 %v815_v5, %s851_s9 }
 0xf77   :  { %v587_v6 = vpop.permute.xlu2 %586 }
 0xf78   :  { %v1015_v8 = vmul.f32 %v587_v6, %v570_v1 }
 0xf7a   :  { %603 = vrot.lane.b32.xlu0 %v1015_v8, %s852_s3  ;;  %v592_v17 = vperm.slane %v1015_v8, 0  ;;  %v591_v23 = vrot.slane %v1015_v8, 1 }
 0xf7c   :  { %v593_v62 = vperm.slane %v591_v23, 0 }
 0xfec   :  { %v604_v9 = vpop.permute.xlu0 %603 }
 0xfed   :  { %748 = vmatmul.msk.f32.vlgmr.msra.gmra.mxu1 %vm77_vm6, %v604_v9  ;;  %v32_v9 = vld [vmem:[%s1094_s4 + $0x10] sm:$0xff] }
 0xfee   :  { %701 = vmatpush.msrb.mxu2 %v32_v9 }
0x106a   :  { %v624_v11 = vpop.f32.mrf.mxu1 }
0x106b   :  { %v627_v12 = vadd.f32 %v624_v11, %v602_v10  ;;  %v31_v10 = vld [vmem:[%s1094_s4 + $0x8] sm:$0xff]  ;;  %v30_v11 = vld [vmem:[%s1094_s4] sm:$0xff]  ;;  %s853_s4 = smov [#allocation4]  }
0x106c   :  { %702 = vmatpush.msrb.mxu2 %v31_v10  ;;  %s718_s21 = sshll.u32 %s853_s4, 4  ;;  %s719_s21 = int_to_ptr.vmem [resolvable:$true] %s718_s21 }
0x106d   :  { %816 = vtanh.f32 %v627_v12  ;;  %v749_v22 = vmul.f32 -1.442695, %v627_v12 }
0x106e   :  { %703 = vmatpush.msrb.mxu2 %v30_v11 }
0x106f   :  { %818 = vpow2.f32 %v749_v22 }
0x1073   :  { %v817_v13 = vpop.eup %816 }
0x1074   :  { %650 = vrot.lane.b32.xlu1 %v817_v13, %s851_s9 }
0x1075   :  { %v819_v24 = vpop.eup %818 }
0x1076   :  { %v631_v25 = vadd.f32 1.0, %v819_v24 }
0x1078   :  { %820 = vrcp.f32 %v631_v25  ;;  %v643_v31 = vand.u32 2147483648, %v631_v25  ;;  %vm637_vm2 = vweird.f32 %v631_v25  ;;  %v641_v32 = vand.u32 2147483647, %v631_v25 }
0x107a   :  { %v644_v35 = vor.u32 1.1754944e-38, %v643_v31  ;;  %vm642_vm1 = vcmp.eq.f32.partialorder %v641_v32, 8.507059e+37 }
0x107c   :  { %143 = vrot.lane.b32.xlu1 %v141_v14, %s852_s3 }
0x107e   :  { %v821_v26 = vpop.eup %820 }
0x107f   :  { %v633_v27 = vmul.f32 %v821_v26, %v631_v25  ;;  %vm638_vm0 = vweird.f32 %v821_v26 }
0x1080   :  { %vm639_vm3 = vmor %vm637_vm2, %vm638_vm0 }
0x1081   :  { %v634_v28 = vsub.f32 1.0, %v633_v27 }
0x1083   :  { %v635_v29 = vmul.f32 %v821_v26, %v634_v28 }
0x1084   :  { %369 = vrot.lane.b32.xlu1 %v367_v15, %s852_s3 }
0x1085   :  { %v636_v30 = vadd.f32 %v821_v26, %v635_v29 }
0x1087   :  { %v640_v33 = vsel %vm639_vm3, %v821_v26, %v636_v30 }
0x1088   :  { %v645_v37 = vsel %vm642_vm1, %v644_v35, %v640_v33 }
0x1089   :  { %v648_v48 = vmul.f32 %v645_v37, %v1011_v4 }
0x108c   :  { %594 = vrot.lane.b32.xlu1 %v592_v17, %s852_s3 }
0x1094   :  { %221 = vrot.lane.b32.xlu1 %v218_v19, %s852_s3 }
0x109c   :  { %446 = vrot.lane.b32.xlu1 %v443_v21, %s852_s3 }
0x10e6   :  { %v651_v36 = vpop.permute.xlu1 %650 }
0x10e7   :  { %v653_v38 = vmul.f32 %v651_v36, %v645_v37 }
0x10e9   :  { %655 = vrot.lane.b32.xlu2 %v653_v38, %s851_s9 }
0x10ee   :  { %v144_v39 = vpop.permute.xlu1 %143 }
0x10ef   :  { %150 = vst.msk [vmem:[#allocation3] sm:$0x1] %vm149_vm4, %v144_v39 }
0x10f1   :  { %219 = vrot.lane.b32.xlu2 %v217_v40, %s852_s3 }
0x10f6   :  { %v370_v41 = vpop.permute.xlu1 %369 }
0x10f7   :  { %375 = vst.msk [vmem:[#allocation3 + $0x3] sm:$0x1] %vm149_vm4, %v370_v41 }
0x10f9   :  { %444 = vrot.lane.b32.xlu2 %v442_v42, %s852_s3 }
0x10fe   :  { %v595_v45 = vpop.permute.xlu1 %594 }
0x10ff   :  { %600 = vst.msk [vmem:[#allocation3 + $0x6] sm:$0x1] %vm149_vm4, %v595_v45 }
0x1101   :  { %296 = vrot.lane.b32.xlu2 %v293_v46, %s852_s3 }
0x1106   :  { %v222_v47 = vpop.permute.xlu1 %221 }
0x1107   :  { %226 = vst.msk [vmem:[#allocation3 + $0x9] sm:$0x1] %vm149_vm4, %v222_v47 }
0x110e   :  { %v447_v60 = vpop.permute.xlu1 %446 }
0x110f   :  { %451 = vst.msk [vmem:[#allocation3 + $0xc] sm:$0x1] %vm149_vm4, %v447_v60 }
0x1143   :  { %v656_v49 = vpop.permute.xlu2 %655 }
0x1144   :  { %v658_v16 = vadd.f32 %v656_v49, %v648_v48 }
0x1146   :  { %822 = vtanh.f32 %v658_v16 }
0x114b   :  { %v220_v50 = vpop.permute.xlu2 %219 }
0x114c   :  { %v823_v52 = vpop.eup %822  ;;  %225 = vst.msk [vmem:[#allocation3 + $0x1] sm:$0x1] %vm149_vm4, %v220_v50 }
0x114d   :  { %661 = vrot.lane.b32.xlu0 %v823_v52, %s851_s9 }
0x1153   :  { %v445_v53 = vpop.permute.xlu2 %444 }
0x1154   :  { %450 = vst.msk [vmem:[#allocation3 + $0x4] sm:$0x1] %vm149_vm4, %v445_v53 }
0x1155   :  { %294 = vrot.lane.b32.xlu0 %v292_v54, %s852_s3 }
0x115b   :  { %v297_v55 = vpop.permute.xlu2 %296 }
0x115c   :  { %301 = vst.msk [vmem:[#allocation3 + $0xa] sm:$0x1] %vm149_vm4, %v297_v55 }
0x115d   :  { %519 = vrot.lane.b32.xlu0 %v517_v56, %s852_s3 }
0x1165   :  { %145 = vrot.lane.b32.xlu0 %v142_v58, %s852_s3 }
0x116d   :  { %371 = vrot.lane.b32.xlu0 %v368_v61, %s852_s3 }
0x1175   :  { %596 = vrot.lane.b32.xlu0 %v593_v62, %s852_s3 }
0x11bf   :  { %v662_v63 = vpop.permute.xlu0 %661 }
0x11c0   :  { %v664_v0 = vmul.f32 %v662_v63, %v645_v37 }
0x11c2   :  { %v666_v1 = vrot.slane %v664_v0, 1  ;;  %v667_v7 = vperm.slane %v664_v0, 0 }
0x11c4   :  { %v668_v2 = vperm.slane %v666_v1, 0  ;;  %669 = vrot.lane.b32.xlu2 %v667_v7, %s852_s3 }
0x11c6   :  { %671 = vrot.lane.b32.xlu1 %v668_v2, %s852_s3 }
0x11c7   :  { %v295_v51 = vpop.permute.xlu0 %294 }
0x11c8   :  { %300 = vst.msk [vmem:[#allocation3 + $0x2] sm:$0x1] %vm149_vm4, %v295_v51 }
0x11cc   :  { %521 = vrot.lane.b32.xlu2 %v518_v3, %s852_s3 }
0x11cf   :  { %v520_v4 = vpop.permute.xlu0 %519 }
0x11d0   :  { %525 = vst.msk [vmem:[#allocation3 + $0x5] sm:$0x1] %vm149_vm4, %v520_v4 }
0x11d7   :  { %v146_v5 = vpop.permute.xlu0 %145 }
0x11d8   :  { %151 = vst.msk [vmem:[#allocation3 + $0x8] sm:$0x1] %vm149_vm4, %v146_v5 }
0x11df   :  { %v372_v6 = vpop.permute.xlu0 %371 }
0x11e0   :  { %376 = vst.msk [vmem:[#allocation3 + $0xb] sm:$0x1] %vm149_vm4, %v372_v6 }
0x11e7   :  { %v597_v8 = vpop.permute.xlu0 %596 }
0x11e8   :  { %601 = vst.msk [vmem:[#allocation3 + $0xe] sm:$0x1] %vm149_vm4, %v597_v8 }
0x121e   :  { %v670_v12 = vpop.permute.xlu2 %669 }
0x121f   :  { %675 = vst.msk [vmem:[#allocation3 + $0x7] sm:$0x1] %vm149_vm4, %v670_v12 }
0x1226   :  { %v522_v13 = vpop.permute.xlu2 %521  ;;  %v677_v14 = vld [vmem:[#allocation3] sm:$0xff] }
0x1227   :  { %526 = vst.msk [vmem:[#allocation3 + $0xd] sm:$0x1] %vm149_vm4, %v522_v13  ;;  %750 = vmatmul.msk.f32.vlgmr.msrb.gmra.mxu2 %vm77_vm6, %v677_v14 }
0x1238   :  { %v672_v15 = vpop.permute.xlu1 %671 }
0x1239   :  { %676 = vst.msk [vmem:[#allocation3 + $0xf] sm:$0x1] %vm149_vm4, %v672_v15 }
0x1240   :  { %v678_v17 = vld [vmem:[#allocation3 + $0x8] sm:$0xff] }
0x1241   :  { %751 = vmatmul.msk.f32.gmra.mxu2 %vm77_vm6, %v678_v17 }
0x12aa   :  { %v705_v19 = vpop.f32.mrf.mxu2 }
0x12ab   :  { %v706_v20 = vadd.f32 %v759_v18, %v705_v19 }
0x12ad   :  { %712 = vst.msk [vmem:[#allocation4] sm:$0xff] %vm711_vm5, %v706_v20 }
0x12c4   :  { %v708_v21 = vpop.f32.mrf.mxu2 }
0x12c5   :  { %v709_v22 = vadd.f32 %v759_v18, %v708_v21 }
0x12c7   :  { %713 = vst.msk [vmem:[#allocation4 + $0x8] sm:$0xff] %vm711_vm5, %v709_v22 }
0x12c8   :  { %726 = dma.vmem_to_hbm [thread:$0]  %s719_s21, 256, %s721_s24, [#allocation5], %s854_s25, %s854_s25, %s855_s26  }
0x12c9   :  { %848 = dma.done.wait [#allocation5], 256  }
0x12ca   :  { %849 = vsyncadd [#allocation5], 4294967040 }
0x12cb   :  { %731 = vsyncpa [#allocation5], 1 }

</bundles_post_ra>
